<compile_context>
chip_gen: v7x
topology: tpu7x:2x2x1
jax: 0.10.0
libtpu: 0.0.40
codegen_flags: <defaults>
</compile_context>

<pallas_src>
import functools

import jax
import jax.numpy as jnp
import numpy as np
from jax.experimental import pallas as pl
from jax.experimental.pallas import tpu as pltpu


def _make_kernel(S, m, TL):
    nh = m - 1                       # halo width in frames (1 for even K, 2 for odd K)
    Kp = m * S                       # zero-padded tap count (multiple of S)
    f32 = jnp.float32

    def kernel(x_ref, h_ref, w_ref, b_ref, o_ref, t_ref):
        x = x_ref[0]                 # (C, TL)  this tile's frames, frames on lanes
        h = h_ref[0, 0]              # (C, nh)  last nh frames of the previous tile
        w = w_ref[...]               # (Kp, C)  zero-padded taps
        bias = b_ref[0]              # scalar from SMEM

        # Per-frame contribution matrices (MXU), f32 accumulate.
        y = jnp.dot(w, x, preferred_element_type=f32)      # (Kp, TL)
        yh = jnp.dot(w, h, preferred_element_type=f32)     # (Kp, nh)

        # Combined frame axis: [halo frames | tile frames | zero pad]. Column c holds the
        # taps of input frame (tile_start - nh + c); tap group j of frame f lands at
        # output frame f + j, so output frame r reads combined column r + nh - j.
        ycat = jnp.concatenate([yh, y, jnp.zeros((Kp, nh), f32)], axis=1)  # (Kp, nh+TL+nh)

        # Single accumulator + one aligned full-width store (no RMW / masked stores).
        acc = jnp.full((S, TL), bias, f32)
        for j in range(m):
            acc = acc + ycat[j * S:(j + 1) * S, nh - j:nh - j + TL]
        o_ref[0] = acc

        # Spill into the next tile's first nh frames. Columns that land in the zero pad
        # contribute nothing; only the LAST tile's spill is kept by the wrapper, so the
        # bias here is only ever counted once (for frames >= L).
        tail = jnp.full((S, nh), bias, f32)
        for j in range(1, m):
            tail = tail + ycat[j * S:(j + 1) * S, TL + nh - j:TL + 2 * nh - j]
        t_ref[0, 0] = tail

    return kernel


def _vmem_capacity_bytes():
    try:
        info = pltpu.get_tpu_info()
        return int(getattr(info, "vmem_capacity_bytes", 64 * 1024 * 1024))
    except Exception:
        return 64 * 1024 * 1024          # v7x-safe fallback


def _vmem_footprint(C, S, m, Kp, TL, itemsize):
    """Generous per-grid-step VMEM estimate (double-buffered I/O + kernel temporaries)."""
    nh = m - 1
    x_io = 2 * C * TL * itemsize                    # double-buffered input tile
    o_io = 2 * S * TL * 4                           # double-buffered f32 output tile
    work = (2 * Kp + (m + 2) * S) * TL * 4          # y, ycat, acc, shifted slices
    small = 2 * C * nh * itemsize + Kp * C * 4 + 2 * S * nh * 4 + (1 << 14)
    return x_io + o_io + work + small


def _choose_tile(N, C, L, S, m, Kp, itemsize, budget):
    """Largest 128-multiple frame tile dividing L that fits the VMEM budget."""
    t = (min(L, 32768) // 128) * 128
    while t >= 128:
        if L % t == 0 and _vmem_footprint(C, S, m, Kp, t, itemsize) <= budget:
            # Megacore balance: with a single batch element keep >= 2 frame tiles.
            if not (N == 1 and L // t < 2 and t > 128):
                return t
        t -= 128
    # TODO(synk): L has no 128-multiple divisor -> single (lane-unaligned) frame tile.
    return L


@functools.partial(jax.jit, static_argnames=("init_len", "block_l"))
def speech_decoder_short(encs1, weight, bias, init_len, block_l=None):
    """encs1: (N, C, L); weight: (C, 1, K); bias: (1,). Returns (N, init_len) float32."""
    N, C, L = encs1.shape
    K = weight.shape[-1]
    S = K // 2
    if S < 1:
        raise ValueError("short_kernel must be >= 2")
    m = -(-K // S)               # ceil(K / S): number of S-wide tap groups (2 or 3)
    nh = m - 1
    Kp = m * S
    T = (L - 1) * S + K
    if init_len > T:
        raise ValueError(f"init_len={init_len} exceeds ConvTranspose1d output length {T}")

    dt = encs1.dtype
    itemsize = jnp.dtype(dt).itemsize
    cap = _vmem_capacity_bytes()
    if block_l is not None:
        TL = block_l
    else:
        TL = _choose_tile(N, C, L, S, m, Kp, itemsize, budget=int(cap * 0.40))
    if L % TL != 0 or TL < 1:
        raise ValueError(f"invalid frame tile TL={TL} for L={L}")
    nb = L // TL
    vmem_limit = int(max(32 * 1024 * 1024,
                         min(cap, 2 * _vmem_footprint(C, S, m, Kp, TL, itemsize))))

    # Weight: (C, 1, K) -> (Kp, C) with zero-padded taps; cast to the input dtype for the
    # MXU (mixed-dtype matmul is not allowed; tests use f32 so this is a no-op here).
    w_kc = weight.reshape(C, K).T.astype(jnp.float32)              # (K, C)
    if Kp > K:
        w_kc = jnp.concatenate([w_kc, jnp.zeros((Kp - K, C), jnp.float32)], axis=0)
    w_kc = w_kc.astype(dt)
    b1 = bias.reshape(1).astype(jnp.float32)                       # SMEM scalar

    # Halo: last nh frames of the previous tile, laid out (N, nb, C, nh) to match the
    # halo BlockSpec (zeros for the first tile). Tiny strided gather; no full-size copy.
    if nb > 1:
        xr = encs1.reshape(N, C, nb, TL)
        prev = jnp.transpose(xr[:, :, :nb - 1, TL - nh:], (0, 2, 1, 3))   # (N, nb-1, C, nh)
        halo = jnp.concatenate([jnp.zeros((N, 1, C, nh), dt), prev], axis=1)
    else:
        halo = jnp.zeros((N, 1, C, nh), dt)

    main, tails = pl.pallas_call(
        _make_kernel(S, m, TL),
        grid=(N, nb),
        in_specs=[
            pl.BlockSpec((1, C, TL), lambda b, i: (b, 0, i)),        # x tile: C sublanes, TL lanes
            pl.BlockSpec((1, 1, C, nh), lambda b, i: (b, i, 0, 0)),  # halo frames
            pl.BlockSpec((Kp, C), lambda b, i: (0, 0)),              # weight, resident
            pl.BlockSpec(memory_space=pltpu.MemorySpace.SMEM),       # bias scalar in SMEM
        ],
        out_specs=[
            pl.BlockSpec((1, S, TL), lambda b, i: (b, 0, i)),        # lane-dense output slab
            pl.BlockSpec((1, 1, S, nh), lambda b, i: (b, i, 0, 0)),  # per-tile spill
        ],
        out_shape=[
            jax.ShapeDtypeStruct((N, S, L), jnp.float32),
            jax.ShapeDtypeStruct((N, nb, S, nh), jnp.float32),
        ],
        compiler_params=pltpu.CompilerParams(
            dimension_semantics=("parallel", "parallel"),
            vmem_limit_bytes=vmem_limit),
    )(encs1, halo, w_kc, b1)

    # Epilogue: trim toward init_len before transposing; only touch the tiny tail when
    # init_len actually reaches past the main frames (times >= L*S).
    F = -(-init_len // S)                                           # frames needed
    if F <= L:
        main_f = main[:, :, :F]                                     # (N, S, F)
        out = jnp.transpose(main_f, (0, 2, 1)).reshape(N, F * S)[:, :init_len]
    else:
        main_flat = jnp.transpose(main, (0, 2, 1)).reshape(N, L * S)
        tail_flat = jnp.transpose(tails[:, nb - 1], (0, 2, 1)).reshape(N, nh * S)
        out = jnp.concatenate([main_flat, tail_flat], axis=1)[:, :init_len]
    return out


def reference_decoder(encs1, weight, bias, init_len):
    """Pure-numpy ConvTranspose1d(C, 1, K, stride=K//2) reference."""
    x = np.asarray(encs1, dtype=np.float64)
    w = np.asarray(weight, dtype=np.float64)[:, 0, :]   # (C, K)
    b = float(np.asarray(bias)[0])
    N, C, L = x.shape
    K = w.shape[1]
    S = K // 2
    T = (L - 1) * S + K
    out = np.full((N, T), b, dtype=np.float64)
    for n in range(N):
        contrib = x[n].T @ w                              # (L, K)
        for l in range(L):
            out[n, l * S:l * S + K] += contrib[l]
    return out[:, :init_len]


if __name__ == "__main__":
    key = jax.random.PRNGKey(0)

    def run_case(n_channels, short_kernel, N, L, init_len, k, block_l=None):
        kw, kb, kx = jax.random.split(k, 3)
        fan = n_channels * short_kernel
        weight = jax.random.normal(kw, (n_channels, 1, short_kernel), jnp.float32) / np.sqrt(fan)
        bias = jax.random.uniform(kb, (1,), jnp.float32, minval=-0.1, maxval=0.1)
        encs1 = jax.random.normal(kx, (N, n_channels, L), jnp.float32)

        out = speech_decoder_short(encs1, weight, bias, init_len, block_l=block_l)
        out = jax.block_until_ready(out)
        ref = reference_decoder(encs1, weight, bias, init_len)
        assert out.shape == (N, init_len), (out.shape, (N, init_len))
        np.testing.assert_allclose(np.asarray(out), ref, rtol=1e-2, atol=5e-3)

    k1, k2, k3, k4, k5 = jax.random.split(key, 5)
    # Even kernel (SpEx+-style short window), single frame tile: N=2, C=32, L=16, K=8, stride=4.
    run_case(n_channels=32, short_kernel=8, N=2, L=16, init_len=60, k=k1)
    # Odd kernel exercises the 3-tap-group overlap-add path (m = 3), single tile.
    run_case(n_channels=32, short_kernel=5, N=2, L=16, init_len=30, k=k2)
    # Multi-tile frame axis (two 128-frame tiles) exercises the halo path.
    run_case(n_channels=32, short_kernel=8, N=2, L=256, init_len=1000, k=k3, block_l=128)
    run_case(n_channels=32, short_kernel=5, N=2, L=256, init_len=500, k=k4, block_l=128)
    # Auto tile ladder (N=1 -> nb>=2 for megacore) + tail/spill epilogue (init_len > L*S).
    run_case(n_channels=16, short_kernel=8, N=1, L=512, init_len=2050, k=k5)

    print("KERNEL_OK")
</pallas_src>

<mosaic_0001>
module attributes {stable_mosaic.version = 11 : i64} {
  func.func @kernel(%arg0: i32, %arg1: i32, %arg2: memref<1x32x16xf32, #tpu.memory_space<vmem>>, %arg3: memref<1x1x32x1xf32, #tpu.memory_space<vmem>>, %arg4: memref<8x32xf32, #tpu.memory_space<vmem>>, %arg5: memref<1xf32, #tpu.memory_space<smem>>, %arg6: memref<1x4x16xf32, #tpu.memory_space<vmem>>, %arg7: memref<1x1x4x1xf32, #tpu.memory_space<vmem>>) attributes {dimension_semantics = [#tpu.dimension_semantics<parallel>, #tpu.dimension_semantics<parallel>], iteration_bounds = array<i64: 2, 1>, scalar_prefetch = 0 : i64, scratch_operands = 0 : i64, tpu.core_type = #tpu.core_type<tc>, window_params = [{transform_indices = @transform_0, window_bounds = array<i64: 1, 32, 16>}, {transform_indices = @transform_1, window_bounds = array<i64: 1, 1, 32, 1>}, {pipeline_mode = #tpu.pipeline_mode<synchronous>, transform_indices = @transform_2, window_bounds = array<i64: 8, 32>}, {transform_indices = @transform_3, window_bounds = array<i64: 1>}, {transform_indices = @transform_4, window_bounds = array<i64: 1, 4, 16>}, {transform_indices = @transform_5, window_bounds = array<i64: 1, 1, 4, 1>}]} {
    %c0 = arith.constant 0 : index
    %c0_0 = arith.constant 0 : index
    %c0_1 = arith.constant 0 : index
    %0 = vector.load %arg2[%c0, %c0_0, %c0_1] : memref<1x32x16xf32, #tpu.memory_space<vmem>>, vector<1x32x16xf32>
    %1 = vector.shape_cast %0 : vector<1x32x16xf32> to vector<32x16xf32>
    %c0_2 = arith.constant 0 : index
    %c0_3 = arith.constant 0 : index
    %c0_4 = arith.constant 0 : index
    %c0_5 = arith.constant 0 : index
    %2 = vector.load %arg3[%c0_2, %c0_3, %c0_4, %c0_5] : memref<1x1x32x1xf32, #tpu.memory_space<vmem>>, vector<1x1x32x1xf32>
    %3 = vector.shape_cast %2 : vector<1x1x32x1xf32> to vector<32x1xf32>
    %c0_6 = arith.constant 0 : index
    %c0_7 = arith.constant 0 : index
    %4 = vector.load %arg4[%c0_6, %c0_7] : memref<8x32xf32, #tpu.memory_space<vmem>>, vector<8x32xf32>
    %c0_8 = arith.constant 0 : index
    %5 = memref.load %arg5[%c0_8] : memref<1xf32, #tpu.memory_space<smem>>
    %cst = arith.constant dense<0.000000e+00> : vector<8x16xf32>
    %6 = tpu.matmul %4, %1, %cst {dimension_numbers = #tpu.dot_dimension_numbers<[1], [0], [0], [1], [0, 0, 1, 1], [], []>} : vector<8x32xf32>, vector<32x16xf32>, vector<8x16xf32> -> vector<8x16xf32>
    %cst_9 = arith.constant dense<0.000000e+00> : vector<8x1xf32>
    %7 = tpu.matmul %4, %3, %cst_9 {dimension_numbers = #tpu.dot_dimension_numbers<[1], [0], [0], [1], [0, 0, 1, 1], [], []>} : vector<8x32xf32>, vector<32x1xf32>, vector<8x1xf32> -> vector<8x1xf32>
    %cst_10 = arith.constant 0.000000e+00 : f32
    %8 = vector.broadcast %cst_10 : f32 to vector<8x1xf32>
    %9 = tpu.concatenate %7, %6, %8 in 1 : vector<8x1xf32>, vector<8x16xf32>, vector<8x1xf32> -> vector<8x18xf32>
    %10 = vector.broadcast %5 : f32 to vector<4x16xf32>
    %11 = vector.extract_strided_slice %9 {offsets = [0, 1], sizes = [4, 16], strides = [1, 1]} : vector<8x18xf32> to vector<4x16xf32>
    %12 = arith.addf %10, %11 : vector<4x16xf32>
    %13 = vector.extract_strided_slice %9 {offsets = [4, 0], sizes = [4, 16], strides = [1, 1]} : vector<8x18xf32> to vector<4x16xf32>
    %14 = arith.addf %12, %13 : vector<4x16xf32>
    %c0_11 = arith.constant 0 : index
    %c0_12 = arith.constant 0 : index
    %c0_13 = arith.constant 0 : index
    %15 = vector.load %arg6[%c0_11, %c0_12, %c0_13] : memref<1x4x16xf32, #tpu.memory_space<vmem>>, vector<1x4x16xf32>
    %16 = vector.shape_cast %15 : vector<1x4x16xf32> to vector<4x16xf32>
    %17 = vector.shape_cast %14 : vector<4x16xf32> to vector<1x4x16xf32>
    tpu.vector_store %arg6[%c0_11, %c0_12, %c0_13], %17 {strides = array<i32>} : memref<1x4x16xf32, #tpu.memory_space<vmem>>, vector<1x4x16xf32>,
    %18 = vector.broadcast %5 : f32 to vector<4x1xf32>
    %19 = vector.extract_strided_slice %9 {offsets = [4, 16], sizes = [4, 1], strides = [1, 1]} : vector<8x18xf32> to vector<4x1xf32>
    %20 = arith.addf %18, %19 : vector<4x1xf32>
    %c0_14 = arith.constant 0 : index
    %c0_15 = arith.constant 0 : index
    %c0_16 = arith.constant 0 : index
    %c0_17 = arith.constant 0 : index
    %21 = vector.load %arg7[%c0_14, %c0_15, %c0_16, %c0_17] : memref<1x1x4x1xf32, #tpu.memory_space<vmem>>, vector<1x1x4x1xf32>
    %22 = vector.shape_cast %21 : vector<1x1x4x1xf32> to vector<4x1xf32>
    %23 = vector.shape_cast %20 : vector<4x1xf32> to vector<1x1x4x1xf32>
    tpu.vector_store %arg7[%c0_14, %c0_15, %c0_16, %c0_17], %23 {strides = array<i32>} : memref<1x1x4x1xf32, #tpu.memory_space<vmem>>, vector<1x1x4x1xf32>,
    return
  }
  func.func @transform_0(%arg0: i32, %arg1: i32) -> (i32, i32, i32) {
    %c0_i32 = arith.constant 0 : i32
    %c0_i32_0 = arith.constant 0 : i32
    return %arg0, %c0_i32, %arg1 : i32, i32, i32
  }
  func.func @transform_1(%arg0: i32, %arg1: i32) -> (i32, i32, i32, i32) {
    %c0_i32 = arith.constant 0 : i32
    %c0_i32_0 = arith.constant 0 : i32
    %c0_i32_1 = arith.constant 0 : i32
    return %arg0, %arg1, %c0_i32, %c0_i32_0 : i32, i32, i32, i32
  }
  func.func @transform_2(%arg0: i32, %arg1: i32) -> (i32, i32) {
    %c0_i32 = arith.constant 0 : i32
    %c0_i32_0 = arith.constant 0 : i32
    %c0_i32_1 = arith.constant 0 : i32
    return %c0_i32, %c0_i32_0 : i32, i32
  }
  func.func @transform_3(%arg0: i32, %arg1: i32) -> i32 {
    %c0_i32 = arith.constant 0 : i32
    %c0_i32_0 = arith.constant 0 : i32
    return %c0_i32 : i32
  }
  func.func @transform_4(%arg0: i32, %arg1: i32) -> (i32, i32, i32) {
    %c0_i32 = arith.constant 0 : i32
    %c0_i32_0 = arith.constant 0 : i32
    return %arg0, %c0_i32, %arg1 : i32, i32, i32
  }
  func.func @transform_5(%arg0: i32, %arg1: i32) -> (i32, i32, i32, i32) {
    %c0_i32 = arith.constant 0 : i32
    %c0_i32_0 = arith.constant 0 : i32
    %c0_i32_1 = arith.constant 0 : i32
    return %arg0, %arg1, %c0_i32, %c0_i32_0 : i32, i32, i32, i32
  }
}

</mosaic_0001>

<bundles_post_ra>
// kernel: speech_decoder_short.1
= control target key start
LH: loop header
LB: loop body
LE: loop exit
PB: predicated region body
PF: predicated region fallthrough
CT: control target
= control target key end

     0   :  { %s1004_s0 = inlined_call_operand.vmem [shape: f32[2,32,16], index: 0, kind: input, shape index: {}]   ;;  %s1005_s1 = inlined_call_operand.vmem [shape: f32[2,1,32,1], index: 1, kind: input, shape index: {}]   ;;  %s1006_s2 = inlined_call_operand.vmem [shape: f32[8,32], index: 2, kind: input, shape index: {}]   ;;  %s1007_s3 = inlined_call_operand.<no memory space> [shape: f32[1], index: 3, kind: input, shape index: {}]   ;;  %s1008_s4 = inlined_call_operand.vmem [shape: f32[2,4,16], index: 4, kind: output, shape index: {0}]   ;;  %s1009_s5 = inlined_call_operand.hbm [shape: f32[2,1,4,1], index: 5, kind: output, shape index: {1}]  }
   0x1   :  { %11 = sst [smem:[#allocation2]] %s1007_s3 }
   0x2   :  { %12 = vsyncpa [#allocation4], 0 }
   0x3   :  { %14 = vsyncpa [#allocation4 + $0x1], 0  ;;  %s879_s20 = smov 0   ;;  %s881_s21 = smov 0  }
   0x4   :  { %s883_s22 = smov 0   ;;  %s885_s23 = smov 0  }
   0x5   :  { %s887_s24 = smov 0   ;;  %s889_s25 = smov 0  }
   0x6 LB: > { %s635_s3 = sadd.s32 4294967295, %s837_s25   ;;  %s636_s26 = sadd.s32 4294967294, %s837_s25   ;;  %s837_s25 = sphi %s889_s25, %s20_s25   ;;  %s833_s24 = sphi %s887_s24, %s1016_s24   ;;  %s829_s23 = sphi %s885_s23, %s1015_s23   ;;  %s825_s22 = sphi %s883_s22, %s1014_s22   ;;  %s821_s21 = sphi %s881_s21, %s1013_s21   ;;  %s817_s20 = sphi %s879_s20, %s1012_s20  }
   0x7   : > { %s32_s27 = sadd.s32 1, %s833_s24  ;;  %s167_s28 = sadd.s32 1, %s825_s22 }
   0x8   : > { %p34_p0 = scmp.ge.s32.totalorder %s32_s27, 2  ;;  %p177_p1 = scmp.ne.s32.totalorder %s825_s22, %s821_s21 }
   0x9   : > { %p178_p2 = scmp.eq.s32.totalorder %s635_s3, 1  ;;  %p183_p3 = scmp.ne.s32.totalorder %s821_s21, %s817_s20 }
   0xa   : > { %s1018_s27 = smov (%p34_p0, %s32_s27), 0  ;;  %p184_p5 = scmp.eq.s32.totalorder %s636_s26, 1 }
   0xb   : > { %p919_p4 = por %p178_p2, %p177_p1  ;;  %s162_s30 = ssub.s32 %s833_s24, %s1018_s27 }
   0xc   : > { %p639_p6 = scmp.ge.s32.totalorder %s837_s25, 1  ;;  %p165_p7 = scmp.eq.s32.totalorder %s162_s30, 0 }
   0xd   : > { %p926_p8 = por %p184_p5, %p183_p3  ;;  %p231_p9 = scmp.lt.s32.totalorder %s837_s25, 3 }
   0xe   : > { %s932_s7 = scalar_select %p165_p7, %s825_s22, %s167_s28  }
   0xf   : > { %p232_p10 = pnand %p639_p6, %p231_p9 }
  0x10   : > { %p278_p11 = scmp.lt.s32.totalorder (!%p232_p10), %s829_s23, 1  ;;  %v839_v0 = vmov (!%p232_p10), 0.0|0.0   ;;  %vm840_vm0 = vmmov (!%p232_p10), 0   ;;  %v841_v1 = vmov (!%p232_p10), 0.0   ;;  %v310_v14 = vld [vmem:[%s1006_s2] sm:$0xff] (!%p232_p10)  ;;  %vm312_vm1 = vcmask (!%p232_p10), 261120  }
  0x11   : > { %235 = sbr.rel (%p232_p10) target bundleno = 615 (0x267), region = 36  ;;  %686 = vmatprep.subr.bf16.mxu0 (!%p232_p10), %v839_v0  ;;  %672 = vmatprep.mubr.msk.f32.mxu0 (!%p232_p10), %vm840_vm0, %v841_v1  ;;  %s842_s18 = smov (!%p232_p10), 1   ;;  %vm460_vm2 = vcmask (!%p232_p10), 7168   ;;  %vm462_vm3 = vcmask (!%p232_p10), 138240   ;;  %vm482_vm4 = vcmask (!%p232_p10), 7172  }
  0x12   : > { %692 = vmatprep.subr.bf16.mxu1 (!%p232_p10), %v839_v0  ;;  %683 = vmatprep.mubr.msk.f32.mxu1 (!%p232_p10), %vm840_vm0, %v841_v1  ;;  %s311_s19 = sld [smem:[#allocation2]] (!%p232_p10)  ;;  %s843_s3 = smov (!%p232_p10), 112  }
  0x13   : > { %s275_s26 = sand.u32 (!%p232_p10), 1, %s821_s21   ;;  %s649_s30 = sshll.u32 (!%p232_p10), %s829_s23, 6 }
  0x14   : > { %s640_s28 = sshll.u32 (!%p232_p10), %s275_s26, 2  ;;  %s953_s13 = scalar_lea.hbm (!%p232_p10), %s1009_s5, %s649_s30 }
  0x15   : > { %s492_s14 = scalar_lea.sflag (!%p232_p10), [#allocation4], %s275_s26 }
  0x18   : > { %s936_s8 = scalar_select %p278_p11, %s829_s23, 1  ;;  %v464_v20 = vstv %s311_s19 }
  0x19   : > { %s844_s23 = smov [#allocation3]  }
  0x1a   : > { %s652_s9 = sshll.u32 %s936_s8, 5  ;;  %s763_s16 = sshll.u32 %s844_s23, 4  ;;  %s764_s16 = int_to_ptr.vmem [resolvable:$false] %s763_s16 }
  0x1b   : > { %s285_s12 = scalar_lea.vmem %s1004_s0, %s652_s9  ;;  %s294_s15 = scalar_lea.vmem %s1005_s1, %s652_s9 }
  0x1c   : > { %v302_v2 = vld [vmem:[%s285_s12] sm:$0xff]  ;;  %v303_v3 = vld [vmem:[%s285_s12 + $0x8] sm:$0xff]  ;;  %v304_v4 = vld [vmem:[%s285_s12 + $0x10] sm:$0xff]  ;;  %s277_s9 = scalar_lea.vmem [#allocation3], %s640_s28  ;;  %s765_s17 = scalar_lea.vmem %s764_s16, 128 }
  0x1d   : > { %v687_v5 = vpack.c.bf16 %v303_v3, %v302_v2  ;;  %v305_v6 = vld [vmem:[%s285_s12 + $0x18] sm:$0xff]  ;;  %v306_v7 = vld [vmem:[%s294_s15] sm:$0xff]  ;;  %v307_v8 = vld [vmem:[%s294_s15 + $0x8] sm:$0xff]  ;;  %s509_s10 = sshll.u32 %s277_s9, 4  ;;  %s955_s10 = int_to_ptr.vmem [resolvable:$true] %s509_s10 }
  0x1e   : > { %v693_v9 = vpack.c.bf16 %v307_v8, %v306_v7  ;;  %v308_v10 = vld [vmem:[%s294_s15 + $0x10] sm:$0xff]  ;;  %v309_v11 = vld [vmem:[%s294_s15 + $0x18] sm:$0xff]  ;;  %v690_v12 = vpack.c.bf16 %v305_v6, %v304_v4  ;;  %s759_s15 = scalar_lea.vmem %s955_s10, 64  ;;  %p766_p1 = scmp.lt.s32.totalorder %s955_s10, %s764_s16 }
  0x1f   : > { %688 = vmatpush3.bf16.msra.mxu0 %v687_v5  ;;  %v696_v13 = vpack.c.bf16 %v309_v11, %v308_v10  ;;  %p760_p12 = scmp.ne.s32.totalorder %s955_s10, %s759_s15  ;;  %p767_p2 = scmp.lt.s32.totalorder %s765_s17, %s759_s15 }
  0x20   : > { %689 = vmatprep.subr.bf16.mxu0 %v839_v0  ;;  %694 = vmatpush3.bf16.msra.mxu1 %v693_v9 }
  0x21   : > { %695 = vmatprep.subr.bf16.mxu1 %v839_v0  ;;  %p761_p13 = pnand %p760_p12, %p919_p4  ;;  %p768_p3 = por %p767_p2, %p766_p1 }
  0x23   : > { %691 = vmatpush3.bf16.msra.mxu0 %v690_v12  ;;  %p762_p0 = pneg %p761_p13 }
  0x24   : > { %697 = vmatpush3.bf16.msra.mxu1 %v696_v13 }
  0x25   : > { %p769_p5 = pnand %p768_p3, %p762_p0 }
  0x26   : > { %673 = vmatmul.mubr.msk.f32.vlgmr.msra.gmra.mrb[0].mxu0 %vm312_vm1, %v310_v14 }
  0x27   : > { %684 = vmatmul.mubr.msk.f32.vlgmr.msra.gmra.mrb[0].mxu1 %vm312_vm1, %v310_v14 }
  0xf9   : > { %v382_v15 = vpop.f32.mrb[0].mxu0 }
  0xfa   : > { %457 = vrot.lane.b32.xlu0 %v382_v15, %s842_s18  ;;  %v674_v16 = vpop.f32.mrb[1].mxu0  ;;  %v452_v17 = vpop.f32.mrb[0].mxu1 }
  0xfb   : > { %v685_v18 = vpop.f32.mrb[1].mxu1 }
 0x16c   : > { %v458_v19 = vpop.permute.xlu0 %457 }
 0x16d   : > { %v461_v21 = vsel %vm460_vm2, %v452_v17, %v458_v19 }
 0x16e   : > { %v463_v22 = vsel %vm462_vm3, %v461_v21, 0.0 }
 0x16f   : > { %v467_v23 = vrot.slane %v463_v22, 4  ;;  %v465_v24 = vadd.f32 %v464_v20, %v463_v22 }
 0x171   : > { %468 = vrot.lane.b32.xlu0 %v467_v23, %s842_s18  ;;  %479 = vrot.lane.b32.xlu1 %v465_v24, %s843_s3 }
 0x1e3   : > { %v469_v25 = vpop.permute.xlu0 %468  ;;  %v480_v26 = vpop.permute.xlu1 %479 }
 0x1e4   : > { %v471_v27 = vadd.f32 %v469_v25, %v465_v24  ;;  %483 = vst.msk [vmem:[%s277_s9 - $0x4] sm:$0xf0] %vm482_vm4, %v480_v26 }
 0x1e5   : > { %772 = shalt.err (!%p769_p5)
}
 0x1e6   : > { %s773_s18 = scalar_lea.hbm %s953_s13, 64  ;;  %s777_s26 = scalar_lea.hbm %s1009_s5, 128 }
 0x1e7   : > { %p774_p6 = scmp.ne.s32.totalorder %s953_s13, %s773_s18  ;;  %p778_p10 = scmp.lt.u32.totalorder %s953_s13, %s1009_s5 }
 0x1e8   : > { %p779_p11 = scmp.lt.u32.totalorder %s777_s26, %s773_s18  ;;  %p781_p13 = scmp.lt.u32.totalorder %s773_s18, %s953_s13 }
 0x1e9   : > { %p775_p7 = pnand %p774_p6, %p919_p4 }
 0x1ea   : > { %p780_p12 = por %p779_p11, %p778_p10 }
 0x1eb   : > { %p776_p9 = pneg %p775_p7 }
 0x1ec   : > { %p782_p0 = por %p781_p13, %p780_p12 }
 0x1ee   : > { %p783_p1 = pnand %p782_p0, %p776_p9 }
 0x1f0   : > { %786 = shalt.err (!%p783_p1)
}
 0x1f1   : > { %698 = dma.vmem_to_hbm [thread:$0]  (%p919_p4), %s955_s10, 64, %s953_s13, %s492_s14   ;;  %vm476_vm5 = vcmask 125952  }
 0x1f2   : > { %s845_s9 = smov 127   ;;  %s645_s11 = sshll.u32 %s936_s8, 2 }
 0x1f3   : > { %473 = vrot.lane.b32.xlu1 %v471_v27, %s845_s9  ;;  %s301_s23 = scalar_lea.vmem %s1008_s4, %s645_s11 }
 0x265   : > { %v474_v28 = vpop.permute.xlu1 %473 }
 0x266   : > { %477 = vst.msk [vmem:[%s301_s23] sm:$0xf] %vm476_vm5, %v474_v28 }
 0x267 PF: > { %p704_p2 = scmp.ge.s32.totalorder %s837_s25, 2  ;;  %s531_s29 = sand.u32 1, %s817_s20  }
 0x268   : > { %s532_s16 = scalar_lea.sflag [#allocation4], %s531_s29 }
 0x269   : > { %p701_p3 = pnand %p704_p2, %p926_p8 }
 0x26b   : > { %812 = dma.done.wait (!%p701_p3), %s532_s16, 64  }
 0x26c   : > { %814 = vsyncadd (!%p701_p3), %s532_s16, 4294967232  ;;  %s20_s25 = sadd.s32 1, %s837_s25   ;;  %s1012_s20 = smov %s821_s21 }
 0x26d   : > { %p17_p4 = scmp.ge.s32.totalorder %s20_s25, 4   ;;  %s1013_s21 = smov %s825_s22 }
 0x26e   : > { %s1014_s22 = smov %s932_s7  ;;  %s1015_s23 = smov %s833_s24 }
 0x26f   : > { %s1016_s24 = smov %s1018_s27  ;;  %19 = sbr.rel (!%p17_p4) target bundleno = 6 (0x6), region = 86 }
 0x276   :  { %537 = vsyncpa [#allocation4], 1 }
 0x277   :  { %539 = vsyncpa [#allocation4 + $0x1], 1 }

</bundles_post_ra>
